<compile_context>
chip_gen: v7x
topology: tpu7x:2x2x1
jax: 0.10.0
libtpu: 0.0.40
codegen_flags: <defaults>
</compile_context>

<pallas_src>
import jax
import jax.numpy as jnp
import numpy as np
from jax.experimental import pallas as pl
from jax.experimental.pallas import tpu as pltpu


# ----------------------------- Pallas kernel -------------------------------
def _smp_kernel(coord_ref, inv_rad_ref, w_ref, tile_ref, bmask_ref, cmat_ref,
                expand_ref, x_ref, out_ref):
    # coord_ref   : (1, OP, D)    flattened sample-point coords of this O-block
    # inv_rad_ref : (1, OP, 1)    precomputed 1/radius per point
    # w_ref       : (1, OI, P)    dense mixing weights of this O-block, rows=(o,i)
    # tile_ref    : (P, OP)       tile_mat[p, c] = (c % P == p)          (static)
    # bmask_ref   : (OI, OP)      block-diagonal indicator                (static)
    # cmat_ref    : (o_blk, OP)   per-block column indicator              (static)
    # expand_ref  : (OI, o_blk)   one-hot row->block expansion            (static)
    # x_ref       : (D, Nt)       query coordinates for this N tile (permuted)
    # out_ref     : (OI, Nt)      kernel values, rows = (o, i) flattened
    coord = coord_ref[0]                  # (OP, D)
    inv_rad = inv_rad_ref[0]              # (OP, 1)
    w = w_ref[0]                          # (OI, P)
    xt = x_ref[...]                       # (D, Nt)
    D = coord.shape[1]

    # L1 distance sum_d |coord[p,d] - x[d,n]| -> (OP, Nt).  Start from d = 0
    # (no zero-fill slab); D is tiny & static so the loop unrolls.
    absdiff = jnp.abs(coord[:, 0:1] - xt[0:1, :])
    for d in range(1, D):
        absdiff = absdiff + jnp.abs(coord[:, d:d + 1] - xt[d:d + 1, :])

    # triangular (hat) basis: relu(1 - |.|_1 * inv_radius)   (no divides)
    act = jnp.maximum(1.0 - absdiff * inv_rad, 0.0)          # (OP, Nt)
    nz = (act > 0.0).astype(jnp.float32)                     # (OP, Nt)

    # Rebuild the (OI, OP) block-diagonal mixing matrix on the MXU from the
    # dense (OI, P) weights (one tiny dot + mask); no inflated HBM stream.
    wbd = jnp.dot(w, tile_ref[...],
                  preferred_element_type=jnp.float32) * bmask_ref[...]   # (OI, OP)

    # One MXU dot mixes all o_blk channels of the block.
    raw = jnp.dot(wbd, act, preferred_element_type=jnp.float32)          # (OI, Nt)

    # Non-zero basis count per (o, n) at o_blk granularity (I-times cheaper).
    cnt = jnp.dot(cmat_ref[...], nz, preferred_element_type=jnp.float32)  # (o_blk, Nt)

    # Reciprocal on the otherwise-idle EUP slot + one Newton step (~1e-7 rel).
    c = cnt + 1e-6
    r = pl.reciprocal(c, approx=True)
    r = r * (2.0 - c * r)                                                 # (o_blk, Nt)

    # Expand the reciprocal to the (OI, Nt) row layout via a tiny one-hot dot.
    inv_cnt = jnp.dot(expand_ref[...], r,
                      preferred_element_type=jnp.float32)                # (OI, Nt)

    # (W @ (act / cnt)) == (W @ act) * (1/cnt)  since cnt is constant over p.
    out_ref[...] = raw * inv_cnt


# ------------------------------ tile picking --------------------------------
def _chip_params():
    kind = ""
    try:
        kind = jax.devices()[0].device_kind.lower()
    except Exception:
        pass
    # MXU contraction tile: 128 on <= v5, 256 on v6e/v7x.
    mxu_k = 128 if any(v in kind for v in ("v2", "v3", "v4", "v5")) else 256
    vmem_cap = None
    try:
        vmem_cap = int(getattr(pltpu.get_tpu_info(), "vmem_capacity_bytes", 0)) or None
    except Exception:
        vmem_cap = None
    if vmem_cap is None:
        vmem_cap = (128 << 20) if any(v in kind for v in ("v5", "v6")) else (64 << 20)
    return mxu_k, vmem_cap


def _pick_tiles(O, I, P, D, N_pad):
    mxu_k, vmem_cap = _chip_params()
    # ~40% of per-core VMEM as the working-set budget, 75% as the scoped limit.
    budget = max(min(int(vmem_cap * 0.40), 64 << 20), 16 << 20)
    vmem_limit = max(min(int(vmem_cap * 0.75), 96 << 20), 32 << 20)

    divisors = [ob for ob in range(O, 0, -1) if O % ob == 0]   # descending

    def ok_layout(ob):
        oi = ob * I
        return (oi % 8 == 0) or (oi == O * I)   # (8,128) rule on the out block

    def bytes_per_col(ob):
        oi, op = ob * I, ob * P
        # x(2x) + out(2x) + absdiff/act/nz + raw/inv_cnt + cnt/reciprocals
        return 4 * (2 * D + 2 * oi + 3 * op + 2 * oi + 2 * ob)

    def max_nt(ob):
        return (budget // bytes_per_col(ob)) // 128 * 128

    cands = [ob for ob in divisors
             if ok_layout(ob) and (ob * P <= mxu_k or ob == 1) and max_nt(ob) >= 128]
    if not cands:
        cands = [ob for ob in divisors if ok_layout(ob) and max_nt(ob) >= 128]
    if not cands:
        cands = sorted(ob for ob in divisors if ok_layout(ob))  # ob == O always valid
    o_blk = cands[0]
    num_ob = O // o_blk

    nt_cap = max(max_nt(o_blk), 128)
    if num_ob == 1 and N_pad >= 256:
        nt_cap = min(nt_cap, N_pad // 2)   # keep >= 2 parallel steps (v7x megacore)
    n_t = 128
    for cand in range(128, N_pad + 1, 128):
        if N_pad % cand == 0 and cand <= nt_cap:
            n_t = cand
    return o_blk, n_t, vmem_limit


# ------------------------------- wrapper ------------------------------------
def smp_kernel_forward(weight_coord, radius, weights, x):
    """weight_coord: (O, P, D); radius: (O, P, 1[, 1]); weights: (O, I, P);
    x: (1, D, *spatial).  Returns the same tensor as SMPKernel.forward."""
    O, P, D = weight_coord.shape
    I = weights.shape[1]
    spatial = x.shape[2:]
    N = int(np.prod(spatial))
    N_pad = ((N + 127) // 128) * 128

    o_blk, n_t, vmem_limit = _pick_tiles(O, I, P, D, N_pad)
    num_ob = O // o_blk
    OP, OI = o_blk * P, o_blk * I

    # Fold the PyTorch epilogue (transpose(-2,-1) then flip(dim=2)) into the
    # column order of the tiny query-coordinate array: output column m = w*H+h
    # must see coordinate x[:, h, W-1-w].
    if D == 2 and len(spatial) == 2:
        Hh, Ww = spatial
        xq = jnp.flip(jnp.swapaxes(x[0], 1, 2), axis=1)        # (D, W, H)
        x_flat = xq.reshape(D, N).astype(jnp.float32)
        out_spatial = (Ww, Hh)
    else:
        x_flat = x.reshape(D, N).astype(jnp.float32)
        out_spatial = spatial
    if N_pad != N:
        x_flat = jnp.pad(x_flat, ((0, 0), (0, N_pad - N)))

    coord = weight_coord.astype(jnp.float32).reshape(num_ob, OP, D)
    inv_rad = (1.0 / radius.astype(jnp.float32).reshape(O, P)).reshape(num_ob, OP, 1)
    w_dense = weights.astype(jnp.float32).reshape(num_ob, OI, P)

    # Tiny, grid-invariant structural matrices (constant index maps -> resident).
    col_blk = np.repeat(np.arange(o_blk), P)                   # (OP,)
    row_blk = np.repeat(np.arange(o_blk), I)                   # (OI,)
    tile_mat = (np.arange(P)[:, None] ==
                (np.arange(OP) % P)[None, :]).astype(np.float32)      # (P, OP)
    bmask = (row_blk[:, None] == col_blk[None, :]).astype(np.float32)  # (OI, OP)
    cmat = (np.arange(o_blk)[:, None] == col_blk[None, :]).astype(np.float32)   # (o_blk, OP)
    expand = (row_blk[:, None] == np.arange(o_blk)[None, :]).astype(np.float32)  # (OI, o_blk)

    flops = int(N_pad * num_ob * (OP * (3 * D + 3) + 2 * OI * OP
                                  + 2 * o_blk * OP + 2 * OI * o_blk
                                  + 4 * o_blk + OI))
    cost = pl.CostEstimate(
        flops=flops,
        transcendentals=int(N_pad * O),
        bytes_accessed=int(4 * (O * I * N_pad + D * N_pad
                                + (N_pad // n_t) * (O * P * (D + 1) + O * I * P)
                                + OI * OP + o_blk * OP + P * OP + OI * o_blk)))

    out = pl.pallas_call(
        _smp_kernel,
        out_shape=jax.ShapeDtypeStruct((O * I, N_pad), jnp.float32),
        grid=(N_pad // n_t, num_ob),          # N outer, O inner -> x tile resident
        in_specs=[
            pl.BlockSpec((1, OP, D), lambda ni, oi: (oi, 0, 0)),
            pl.BlockSpec((1, OP, 1), lambda ni, oi: (oi, 0, 0)),
            pl.BlockSpec((1, OI, P), lambda ni, oi: (oi, 0, 0)),
            pl.BlockSpec((P, OP), lambda ni, oi: (0, 0)),
            pl.BlockSpec((OI, OP), lambda ni, oi: (0, 0)),
            pl.BlockSpec((o_blk, OP), lambda ni, oi: (0, 0)),
            pl.BlockSpec((OI, o_blk), lambda ni, oi: (0, 0)),
            pl.BlockSpec((D, n_t), lambda ni, oi: (0, ni)),
        ],
        out_specs=pl.BlockSpec((OI, n_t), lambda ni, oi: (oi, ni)),
        compiler_params=pltpu.CompilerParams(
            dimension_semantics=("parallel", "parallel"),
            vmem_limit_bytes=int(vmem_limit)),
        cost_estimate=cost,
    )(coord, inv_rad, w_dense,
      jnp.asarray(tile_mat), jnp.asarray(bmask), jnp.asarray(cmat),
      jnp.asarray(expand), x_flat)

    out = out[:, :N]
    return out.reshape(O, I, *out_spatial)


# ------------------------- pure-JAX reference --------------------------------
def smp_reference(weight_coord, radius, weights, x):
    O, P, D = weight_coord.shape
    I = weights.shape[1]
    spatial = x.shape[2:]
    diff = weight_coord[:, :, None, :] - jnp.swapaxes(x.reshape(1, D, -1), 1, 2)
    diff = jnp.swapaxes(diff, 2, 3).reshape(O, P, D, *spatial)
    diff = jax.nn.relu(1.0 - jnp.sum(jnp.abs(diff), axis=2) / radius)
    non_zero = (diff != 0)
    count_weight = 1.0 / (jnp.sum(non_zero, axis=1, keepdims=True) + 1e-6)
    weighted = count_weight * diff
    kernels = jnp.matmul(weights, weighted.reshape(O, P, -1))
    kernels = kernels.reshape(O, I, *spatial)
    if D == 2:
        kernels = jnp.flip(jnp.swapaxes(kernels, -2, -1), axis=2)
    return kernels


# ------------------------------ parameters -----------------------------------
def init_params(key, dim_linear, in_channels, out_channels, n_points,
                radius_val, coord_std):
    k1, k2 = jax.random.split(key, 2)
    if dim_linear == 1:
        wc = coord_std * jax.random.truncated_normal(
            k1, -1.0 / coord_std, 0.0, (out_channels, n_points, dim_linear),
            jnp.float32)
        wc = wc * 2.0 + 1.0
    else:  # dim_linear == 2
        wc = coord_std * jax.random.truncated_normal(
            k1, -1.0 / coord_std, 1.0 / coord_std,
            (out_channels, n_points, dim_linear), jnp.float32)
    radius = jnp.full((out_channels, n_points) + (1,) * dim_linear,
                      radius_val, jnp.float32)
    weights = 0.02 * jax.random.truncated_normal(
        k2, -2.0, 2.0, (out_channels, in_channels, n_points), jnp.float32)
    return wc, radius, weights


# --------------------------------- main --------------------------------------
if __name__ == "__main__":
    dim_linear = 2
    in_channels = 4
    out_channels = 4
    n_points = 8
    radius_val = 0.5
    coord_std = 1.0
    H = W = 16

    key = jax.random.PRNGKey(0)
    kp, kx = jax.random.split(key)
    weight_coord, radius, weights = init_params(
        kp, dim_linear, in_channels, out_channels, n_points,
        radius_val, coord_std)

    # x: relative-coordinate grid in [-1, 1], NCHW-style (1, dim_linear, H, W)
    ys = jnp.linspace(-1.0, 1.0, H)
    xs = jnp.linspace(-1.0, 1.0, W)
    gy, gx = jnp.meshgrid(ys, xs, indexing="ij")
    x = jnp.stack([gy, gx], axis=0)[None].astype(jnp.float32)   # (1, 2, H, W)

    out = jax.block_until_ready(smp_kernel_forward(weight_coord, radius, weights, x))
    ref = jax.block_until_ready(smp_reference(weight_coord, radius, weights, x))

    assert out.shape == (out_channels, in_channels, W, H), out.shape
    np.testing.assert_allclose(np.asarray(out), np.asarray(ref),
                               rtol=1e-5, atol=1e-6)
    print("KERNEL_OK")
</pallas_src>

<mosaic_0001>
module attributes {stable_mosaic.version = 11 : i64} {
  func.func @_smp_kernel(%arg0: i32, %arg1: i32, %arg2: memref<1x32x2xf32, #tpu.memory_space<vmem>>, %arg3: memref<1x32x1xf32, #tpu.memory_space<vmem>>, %arg4: memref<1x16x8xf32, #tpu.memory_space<vmem>>, %arg5: memref<8x32xf32, #tpu.memory_space<vmem>>, %arg6: memref<16x32xf32, #tpu.memory_space<vmem>>, %arg7: memref<4x32xf32, #tpu.memory_space<vmem>>, %arg8: memref<16x4xf32, #tpu.memory_space<vmem>>, %arg9: memref<2x128xf32, #tpu.memory_space<vmem>>, %arg10: memref<16x128xf32, #tpu.memory_space<vmem>>) attributes {dimension_semantics = [#tpu.dimension_semantics<parallel>, #tpu.dimension_semantics<parallel>], iteration_bounds = array<i64: 2, 1>, scalar_prefetch = 0 : i64, scratch_operands = 0 : i64, tpu.core_type = #tpu.core_type<tc>, window_params = [{transform_indices = @transform_0, window_bounds = array<i64: 1, 32, 2>}, {transform_indices = @transform_1, window_bounds = array<i64: 1, 32, 1>}, {transform_indices = @transform_2, window_bounds = array<i64: 1, 16, 8>}, {pipeline_mode = #tpu.pipeline_mode<synchronous>, transform_indices = @transform_3, window_bounds = array<i64: 8, 32>}, {pipeline_mode = #tpu.pipeline_mode<synchronous>, transform_indices = @transform_4, window_bounds = array<i64: 16, 32>}, {pipeline_mode = #tpu.pipeline_mode<synchronous>, transform_indices = @transform_5, window_bounds = array<i64: 4, 32>}, {pipeline_mode = #tpu.pipeline_mode<synchronous>, transform_indices = @transform_6, window_bounds = array<i64: 16, 4>}, {transform_indices = @transform_7, window_bounds = array<i64: 2, 128>}, {transform_indices = @transform_8, window_bounds = array<i64: 16, 128>}]} {
    %c0 = arith.constant 0 : index
    %c0_0 = arith.constant 0 : index
    %c0_1 = arith.constant 0 : index
    %0 = vector.load %arg2[%c0, %c0_0, %c0_1] : memref<1x32x2xf32, #tpu.memory_space<vmem>>, vector<1x32x2xf32>
    %1 = vector.shape_cast %0 : vector<1x32x2xf32> to vector<32x2xf32>
    %c0_2 = arith.constant 0 : index
    %c0_3 = arith.constant 0 : index
    %c0_4 = arith.constant 0 : index
    %2 = vector.load %arg3[%c0_2, %c0_3, %c0_4] : memref<1x32x1xf32, #tpu.memory_space<vmem>>, vector<1x32x1xf32>
    %3 = vector.shape_cast %2 : vector<1x32x1xf32> to vector<32x1xf32>
    %c0_5 = arith.constant 0 : index
    %c0_6 = arith.constant 0 : index
    %c0_7 = arith.constant 0 : index
    %4 = vector.load %arg4[%c0_5, %c0_6, %c0_7] : memref<1x16x8xf32, #tpu.memory_space<vmem>>, vector<1x16x8xf32>
    %5 = vector.shape_cast %4 : vector<1x16x8xf32> to vector<16x8xf32>
    %c0_8 = arith.constant 0 : index
    %c0_9 = arith.constant 0 : index
    %6 = vector.load %arg9[%c0_8, %c0_9] : memref<2x128xf32, #tpu.memory_space<vmem>>, vector<2x128xf32>
    %7 = vector.extract_strided_slice %1 {offsets = [0, 0], sizes = [32, 1], strides = [1, 1]} : vector<32x2xf32> to vector<32x1xf32>
    %8 = vector.extract_strided_slice %6 {offsets = [0, 0], sizes = [1, 128], strides = [1, 1]} : vector<2x128xf32> to vector<1x128xf32>
    %9 = vector.broadcast %7 : vector<32x1xf32> to vector<32x128xf32>
    %10 = vector.broadcast %8 : vector<1x128xf32> to vector<32x128xf32>
    %11 = arith.subf %9, %10 : vector<32x128xf32>
    %12 = math.absf %11 : vector<32x128xf32>
    %13 = vector.extract_strided_slice %1 {offsets = [0, 1], sizes = [32, 1], strides = [1, 1]} : vector<32x2xf32> to vector<32x1xf32>
    %14 = vector.extract_strided_slice %6 {offsets = [1, 0], sizes = [1, 128], strides = [1, 1]} : vector<2x128xf32> to vector<1x128xf32>
    %15 = vector.broadcast %13 : vector<32x1xf32> to vector<32x128xf32>
    %16 = vector.broadcast %14 : vector<1x128xf32> to vector<32x128xf32>
    %17 = arith.subf %15, %16 : vector<32x128xf32>
    %18 = math.absf %17 : vector<32x128xf32>
    %19 = arith.addf %12, %18 : vector<32x128xf32>
    %20 = vector.broadcast %3 : vector<32x1xf32> to vector<32x128xf32>
    %21 = arith.mulf %19, %20 : vector<32x128xf32>
    %cst = arith.constant 1.000000e+00 : f32
    %22 = vector.broadcast %cst : f32 to vector<32x128xf32>
    %23 = arith.subf %22, %21 : vector<32x128xf32>
    %cst_10 = arith.constant 0.000000e+00 : f32
    %24 = vector.broadcast %cst_10 : f32 to vector<32x128xf32>
    %25 = arith.maximumf %23, %24 : vector<32x128xf32>
    %cst_11 = arith.constant 0.000000e+00 : f32
    %26 = vector.broadcast %cst_11 : f32 to vector<32x128xf32>
    %27 = arith.cmpf ogt, %25, %26 : vector<32x128xf32>
    %28 = arith.extui %27 : vector<32x128xi1> to vector<32x128xi32>
    %29 = arith.sitofp %28 : vector<32x128xi32> to vector<32x128xf32>
    %c0_12 = arith.constant 0 : index
    %c0_13 = arith.constant 0 : index
    %30 = vector.load %arg5[%c0_12, %c0_13] : memref<8x32xf32, #tpu.memory_space<vmem>>, vector<8x32xf32>
    %cst_14 = arith.constant dense<0.000000e+00> : vector<16x32xf32>
    %31 = tpu.matmul %5, %30, %cst_14 {dimension_numbers = #tpu.dot_dimension_numbers<[1], [0], [0], [1], [0, 0, 1, 1], [], []>} : vector<16x8xf32>, vector<8x32xf32>, vector<16x32xf32> -> vector<16x32xf32>
    %c0_15 = arith.constant 0 : index
    %c0_16 = arith.constant 0 : index
    %32 = vector.load %arg6[%c0_15, %c0_16] : memref<16x32xf32, #tpu.memory_space<vmem>>, vector<16x32xf32>
    %33 = arith.mulf %31, %32 : vector<16x32xf32>
    %cst_17 = arith.constant dense<0.000000e+00> : vector<16x128xf32>
    %34 = tpu.matmul %33, %25, %cst_17 {dimension_numbers = #tpu.dot_dimension_numbers<[1], [0], [0], [1], [0, 0, 1, 1], [], []>} : vector<16x32xf32>, vector<32x128xf32>, vector<16x128xf32> -> vector<16x128xf32>
    %c0_18 = arith.constant 0 : index
    %c0_19 = arith.constant 0 : index
    %35 = vector.load %arg7[%c0_18, %c0_19] : memref<4x32xf32, #tpu.memory_space<vmem>>, vector<4x32xf32>
    %cst_20 = arith.constant dense<0.000000e+00> : vector<4x128xf32>
    %36 = tpu.matmul %35, %29, %cst_20 {dimension_numbers = #tpu.dot_dimension_numbers<[1], [0], [0], [1], [0, 0, 1, 1], [], []>} : vector<4x32xf32>, vector<32x128xf32>, vector<4x128xf32> -> vector<4x128xf32>
    %cst_21 = arith.constant 9.99999997E-7 : f32
    %37 = vector.broadcast %cst_21 : f32 to vector<4x128xf32>
    %38 = arith.addf %36, %37 : vector<4x128xf32>
    %39 = tpu.reciprocal %38 {approx = true} : vector<4x128xf32> -> vector<4x128xf32>
    %40 = arith.mulf %38, %39 : vector<4x128xf32>
    %cst_22 = arith.constant 2.000000e+00 : f32
    %41 = vector.broadcast %cst_22 : f32 to vector<4x128xf32>
    %42 = arith.subf %41, %40 : vector<4x128xf32>
    %43 = arith.mulf %39, %42 : vector<4x128xf32>
    %c0_23 = arith.constant 0 : index
    %c0_24 = arith.constant 0 : index
    %44 = vector.load %arg8[%c0_23, %c0_24] : memref<16x4xf32, #tpu.memory_space<vmem>>, vector<16x4xf32>
    %cst_25 = arith.constant dense<0.000000e+00> : vector<16x128xf32>
    %45 = tpu.matmul %44, %43, %cst_25 {dimension_numbers = #tpu.dot_dimension_numbers<[1], [0], [0], [1], [0, 0, 1, 1], [], []>} : vector<16x4xf32>, vector<4x128xf32>, vector<16x128xf32> -> vector<16x128xf32>
    %46 = arith.mulf %34, %45 : vector<16x128xf32>
    %c0_26 = arith.constant 0 : index
    %c0_27 = arith.constant 0 : index
    %47 = vector.load %arg10[%c0_26, %c0_27] : memref<16x128xf32, #tpu.memory_space<vmem>>, vector<16x128xf32>
    tpu.vector_store %arg10[%c0_26, %c0_27], %46 {strides = array<i32>} : memref<16x128xf32, #tpu.memory_space<vmem>>, vector<16x128xf32>,
    return
  }
  func.func @transform_0(%arg0: i32, %arg1: i32) -> (i32, i32, i32) {
    %c0_i32 = arith.constant 0 : i32
    %c0_i32_0 = arith.constant 0 : i32
    %c0_i32_1 = arith.constant 0 : i32
    return %arg1, %c0_i32, %c0_i32_0 : i32, i32, i32
  }
  func.func @transform_1(%arg0: i32, %arg1: i32) -> (i32, i32, i32) {
    %c0_i32 = arith.constant 0 : i32
    %c0_i32_0 = arith.constant 0 : i32
    %c0_i32_1 = arith.constant 0 : i32
    return %arg1, %c0_i32, %c0_i32_0 : i32, i32, i32
  }
  func.func @transform_2(%arg0: i32, %arg1: i32) -> (i32, i32, i32) {
    %c0_i32 = arith.constant 0 : i32
    %c0_i32_0 = arith.constant 0 : i32
    %c0_i32_1 = arith.constant 0 : i32
    return %arg1, %c0_i32, %c0_i32_0 : i32, i32, i32
  }
  func.func @transform_3(%arg0: i32, %arg1: i32) -> (i32, i32) {
    %c0_i32 = arith.constant 0 : i32
    %c0_i32_0 = arith.constant 0 : i32
    %c0_i32_1 = arith.constant 0 : i32
    return %c0_i32, %c0_i32_0 : i32, i32
  }
  func.func @transform_4(%arg0: i32, %arg1: i32) -> (i32, i32) {
    %c0_i32 = arith.constant 0 : i32
    %c0_i32_0 = arith.constant 0 : i32
    %c0_i32_1 = arith.constant 0 : i32
    return %c0_i32, %c0_i32_0 : i32, i32
  }
  func.func @transform_5(%arg0: i32, %arg1: i32) -> (i32, i32) {
    %c0_i32 = arith.constant 0 : i32
    %c0_i32_0 = arith.constant 0 : i32
    %c0_i32_1 = arith.constant 0 : i32
    return %c0_i32, %c0_i32_0 : i32, i32
  }
  func.func @transform_6(%arg0: i32, %arg1: i32) -> (i32, i32) {
    %c0_i32 = arith.constant 0 : i32
    %c0_i32_0 = arith.constant 0 : i32
    %c0_i32_1 = arith.constant 0 : i32
    return %c0_i32, %c0_i32_0 : i32, i32
  }
  func.func @transform_7(%arg0: i32, %arg1: i32) -> (i32, i32) {
    %c0_i32 = arith.constant 0 : i32
    %c0_i32_0 = arith.constant 0 : i32
    return %c0_i32, %arg0 : i32, i32
  }
  func.func @transform_8(%arg0: i32, %arg1: i32) -> (i32, i32) {
    %c0_i32 = arith.constant 0 : i32
    return %arg1, %arg0 : i32, i32
  }
}

</mosaic_0001>

<bundles_post_ra>
// kernel: tpu_custom_call.1
= control target key start
LH: loop header
LB: loop body
LE: loop exit
PB: predicated region body
PF: predicated region fallthrough
CT: control target
= control target key end

     0   :  { %13 = vsyncpa [#allocation3], 0  ;;  %s1432_s0 = inlined_call_operand.vmem [shape: f32[1,32,2], index: 0, kind: input, shape index: {}]   ;;  %s1433_s1 = inlined_call_operand.vmem [shape: f32[1,32,1], index: 1, kind: input, shape index: {}]   ;;  %s1434_s2 = inlined_call_operand.vmem [shape: f32[1,16,8], index: 2, kind: input, shape index: {}]   ;;  %s1435_s3 = inlined_call_operand.vmem [shape: f32[8,32], index: 3, kind: input, shape index: {}]   ;;  %s1436_s4 = inlined_call_operand.vmem [shape: f32[16,32], index: 4, kind: input, shape index: {}]   ;;  %s1437_s5 = inlined_call_operand.vmem [shape: f32[4,32], index: 5, kind: input, shape index: {}]   ;;  %s1438_s6 = inlined_call_operand.vmem [shape: f32[16,4], index: 6, kind: input, shape index: {}]   ;;  %s1439_s7 = inlined_call_operand.vmem [shape: f32[2,256], index: 7, kind: input, shape index: {}]   ;;  %s1440_s8 = inlined_call_operand.hbm [shape: f32[16,256], index: 8, kind: output, shape index: {}]  }
   0x1   :  { %15 = vsyncpa [#allocation3 + $0x1], 0  ;;  %s1267_s27 = smov 0   ;;  %s1269_s28 = smov 0  }
   0x2   :  { %s1271_s29 = smov 0   ;;  %s1273_s30 = smov 0  }
   0x3   :  { %s1275_s9 = smov 0   ;;  %s1277_s10 = smov 0  }
   0x4 LB: > { %s967_s11 = sadd.s32 4294967295, %s1210_s10   ;;  %s968_s12 = sadd.s32 4294967294, %s1210_s10   ;;  %s1210_s10 = sphi %s1277_s10, %s21_s10   ;;  %s1206_s9 = sphi %s1275_s9, %s1447_s9   ;;  %s1202_s30 = sphi %s1273_s30, %s1446_s30   ;;  %s1198_s29 = sphi %s1271_s29, %s1445_s29   ;;  %s1194_s28 = sphi %s1269_s28, %s1444_s28   ;;  %s1190_s27 = sphi %s1267_s27, %s1443_s27  }
   0x5   : > { %s33_s13 = sadd.s32 1, %s1206_s9  ;;  %s230_s14 = sadd.s32 1, %s1198_s29 }
   0x6   : > { %p35_p0 = scmp.ge.s32.totalorder %s33_s13, 2  ;;  %p240_p1 = scmp.ne.s32.totalorder %s1198_s29, %s1194_s28 }
   0x7   : > { %p241_p2 = scmp.eq.s32.totalorder %s967_s11, 1  ;;  %p246_p3 = scmp.ne.s32.totalorder %s1194_s28, %s1190_s27 }
   0x8   : > { %s1449_s13 = smov (%p35_p0, %s33_s13), 0  ;;  %p247_p5 = scmp.eq.s32.totalorder %s968_s12, 1 }
   0x9   : > { %p1307_p4 = por %p241_p2, %p240_p1  ;;  %s226_s16 = ssub.s32 %s1206_s9, %s1449_s13 }
   0xa   : > { %p974_p6 = scmp.ge.s32.totalorder %s1210_s10, 1  ;;  %p228_p7 = scmp.eq.s32.totalorder %s226_s16, 0 }
   0xb   : > { %p1314_p8 = por %p247_p5, %p246_p3  ;;  %p308_p9 = scmp.lt.s32.totalorder %s1210_s10, 3 }
   0xc   : > { %s1320_s18 = scalar_select %p228_p7, %s1198_s29, %s230_s14  }
   0xd   : > { %p309_p10 = pnand %p974_p6, %p308_p9 }
   0xe   : > { %v378_v0 = vld [vmem:[%s1432_s0 + $0x10] sm:$0xff] (!%p309_p10)  ;;  %v376_v1 = vld [vmem:[%s1432_s0] sm:$0xff] (!%p309_p10)  ;;  %v1212_v2 = vmov (!%p309_p10), 1   ;;  %v377_v3 = vld [vmem:[%s1432_s0 + $0x8] sm:$0xff] (!%p309_p10)  ;;  %v1213_v4 = vmov (!%p309_p10), 0   ;;  %vm496_vm0 = vcmask (!%p309_p10), 64512   ;;  %v407_v15 = vlaneseq (!%p309_p10) }
   0xf   : > { %312 = sbr.rel (%p309_p10) target bundleno = 646 (0x286), region = 52  ;;  %1126 = vset.pattern.permute.xlu0 (!%p309_p10), %v1212_v2  ;;  %1124 = vset.pattern.permute.xlu1 (!%p309_p10), %v1212_v2  ;;  %v379_v5 = vld [vmem:[%s1432_s0 + $0x18] sm:$0xff] (!%p309_p10)  ;;  %v381_v6 = vld [vmem:[%s1433_s1 + $0x8] sm:$0xff] (!%p309_p10)  ;;  %v380_v7 = vld [vmem:[%s1433_s1] sm:$0xff] (!%p309_p10)  ;;  %v1214_v12 = vmov (!%p309_p10), 0.0|0.0   ;;  %vm1215_vm1 = vmmov (!%p309_p10), 0  }
  0x10   : > { %428 = vperm.xlu0 (!%p309_p10), %1126, %v378_v0   ;;  %420 = vperm.xlu1 (!%p309_p10), %1124, %v376_v1   ;;  %v382_v8 = vld [vmem:[%s1433_s1 + $0x10] sm:$0xff] (!%p309_p10)  ;;  %v495_v9 = vld [vmem:[%s1435_s3] sm:$0xff] (!%p309_p10)  ;;  %v383_v10 = vld [vmem:[%s1433_s1 + $0x18] sm:$0xff] (!%p309_p10)  ;;  %v1216_v14 = vmov (!%p309_p10), 0.0   ;;  %p371_p11 = scmp.lt.s32.totalorder (!%p309_p10), %s1202_s30, 1  ;;  %v408_v16 = vshrl.u32 (!%p309_p10), %v407_v15, 7 }
  0x11   : > { %1014 = vmatprep.subr.mxu0 (!%p309_p10), %v495_v9  ;;  %v384_v11 = vld [vmem:[%s1434_s2] sm:$0xff] (!%p309_p10)  ;;  %v385_v13 = vld [vmem:[%s1434_s2 + $0x8] sm:$0xff] (!%p309_p10)  ;;  %vm582_vm8 = vcmask (!%p309_p10), 261120   ;;  %vm744_vm9 = vcmask (!%p309_p10), 31744   ;;  %vm751_vm10 = vcmask (!%p309_p10), 1043456   ;;  %s353_s20 = sand.u32 (!%p309_p10), 1, %s1194_s28  }
  0x12   : > { %1015 = vmatpush3.msra.mxu0 (!%p309_p10), %v495_v9  ;;  %1016 = vmatprep.mubr.msk.f32.mxu0 (!%p309_p10), %vm496_vm0, %v384_v11  ;;  %v409_v19 = vsub.s32 (!%p309_p10), 0, %v408_v16  ;;  %v437_v20 = vsub.s32 (!%p309_p10), 1, %v408_v16  ;;  %s994_s24 = sshll.u32 (!%p309_p10), %s1202_s30, 7  ;;  %s1386_s12 = scalar_lea.sflag (!%p309_p10), [#allocation3], %s353_s20 }
  0x13   : > { %1054 = vmatprep.subr.bf16.mxu0 (!%p309_p10), %v1214_v12  ;;  %1017 = vmatmul.mubr.msk.f32.vlgmr.msra.gmra.mrb[0].mxu0 (!%p309_p10), %vm496_vm0, %v385_v13  ;;  %s1384_s11 = scalar_lea.hbm (!%p309_p10), %s1440_s8, %s994_s24 }
  0x14   : > { %1127 = vset.pattern.permute.xlu0 (!%p309_p10), %v1213_v4  ;;  %424 = vperm.xlu1 (!%p309_p10), %1124, %v377_v3  }
  0x15   : > { %389 = vperm.xlu0 (!%p309_p10), %1127, %v376_v1   ;;  %1038 = vmatprep.mubr.msk.f32.mxu0 (!%p309_p10), %vm1215_vm1, %v1216_v14 }
  0x16   : > { %s372_s14 = scalar_select %p371_p11, %s1202_s30, 1 }
  0x17   : > { %s1218_s30 = smov [#allocation2]  }
  0x18   : > { %1125 = vset.pattern.permute.xlu1 %v1213_v4  ;;  %s976_s16 = sshll.u32 %s372_s14, 1 }
  0x19   : > { %394 = vperm.xlu0 %1127, %v377_v3   ;;  %404 = vperm.xlu1 %1125, %v379_v5   ;;  %s374_s21 = scalar_lea.vmem %s1439_s7, %s976_s16  ;;  %s1136_s16 = sshll.u32 %s1218_s30, 4  ;;  %s1137_s16 = int_to_ptr.vmem [resolvable:$false] %s1136_s16 }
  0x1a   : > { %v386_v22 = vld [vmem:[%s374_s21] sm:$0x3]  ;;  %s975_s21 = sshll.u32 %s353_s20, 4  ;;  %s1138_s19 = scalar_lea.vmem %s1137_s16, 512 }
  0x1b   : > { %v410_v24 = vrot.slane %v386_v22, %v409_v19  ;;  %v438_v25 = vrot.slane %v386_v22, %v437_v20  ;;  %v743_v20 = vld [vmem:[%s1438_s6 + $0x8] sm:$0xff]  ;;  %s355_s22 = scalar_lea.vmem [#allocation2], %s975_s21 }
  0x1c   : > { %s850_s23 = sshll.u32 %s355_s22, 4  ;;  %s1379_s23 = int_to_ptr.vmem [resolvable:$true] %s850_s23 }
  0x1d   : > { %399 = vperm.xlu0 %1127, %v378_v0   ;;  %1128 = vset.pattern.permute.xlu1 %v1212_v2  ;;  %v1217_v0 = vmov 1.0|1.0   ;;  %s1132_s14 = scalar_lea.vmem %s1379_s23, 256  ;;  %p1139_p1 = scmp.lt.s32.totalorder %s1379_s23, %s1137_s16 }
  0x1e   : > { %432 = vperm.xlu1 %1128, %v379_v5   ;;  %v664_v5 = vld [vmem:[%s1437_s5] sm:$0xf]  ;;  %p1133_p12 = scmp.ne.s32.totalorder %s1379_s23, %s1132_s14  ;;  %p1140_p2 = scmp.lt.s32.totalorder %s1138_s19, %s1132_s14 }
  0x20   : > { %p1134_p13 = pnand %p1133_p12, %p1307_p4  ;;  %p1141_p3 = por %p1140_p2, %p1139_p1 }
  0x21   : > { %458 = vperm.xlu0 %1127, %v381_v6   ;;  %v579_v6 = vld [vmem:[%s1436_s4 + $0x8] sm:$0xff] }
  0x22   : > { %1129 = vset.pattern.permute.xlu1 %v1213_v4  ;;  %p1135_p0 = pneg %p1134_p13 }
  0x23   : > { %453 = vperm.xlu1 %1129, %v380_v7   ;;  %v578_v7 = vld [vmem:[%s1436_s4] sm:$0xff] }
  0x24   : > { %p1142_p5 = pnand %p1141_p3, %p1135_p0 }
  0x27   : > { %463 = vperm.xlu1 %1129, %v382_v8  }
  0x2b   : > { %468 = vperm.xlu1 %1129, %v383_v10  }
  0x8f   : > { %v421_v17 = vpop.permute.xlu1 %420  ;;  %v429_v18 = vpop.permute.xlu0 %428 }
  0x90   : > { %v439_v31 = vsub.f32 %v421_v17, %v438_v25  ;;  %v441_v39 = vsub.f32 %v429_v18, %v438_v25 }
  0x92   : > { %v443_v38 = vand.u32 2147483647, %v439_v31  ;;  %v445_v48 = vand.u32 2147483647, %v441_v39 }
  0x93   : > { %v425_v21 = vpop.permute.xlu1 %424 }
  0x94   : > { %v390_v23 = vpop.permute.xlu0 %389  ;;  %v440_v28 = vsub.f32 %v425_v21, %v438_v25 }
  0x95   : > { %v411_v29 = vsub.f32 %v390_v23, %v410_v24 }
  0x96   : > { %v444_v34 = vand.u32 2147483647, %v440_v28 }
  0x97   : > { %v415_v35 = vand.u32 2147483647, %v411_v29 }
  0x98   : > { %v395_v26 = vpop.permute.xlu0 %394  ;;  %v405_v27 = vpop.permute.xlu1 %404 }
  0x99   : > { %v412_v30 = vsub.f32 %v395_v26, %v410_v24  ;;  %v447_v45 = vadd.f32 %v443_v38, %v415_v35  ;;  %v414_v46 = vsub.f32 %v405_v27, %v410_v24 }
  0x9b   : > { %v416_v32 = vand.u32 2147483647, %v412_v30  ;;  %v418_v55 = vand.u32 2147483647, %v414_v46 }
  0x9c   : > { %v400_v33 = vpop.permute.xlu0 %399 }
  0x9d   : > { %v413_v36 = vsub.f32 %v400_v33, %v410_v24  ;;  %v433_v37 = vpop.permute.xlu1 %432  ;;  %v448_v40 = vadd.f32 %v444_v34, %v416_v32 }
  0x9e   : > { %v442_v41 = vsub.f32 %v433_v37, %v438_v25 }
  0x9f   : > { %v417_v43 = vand.u32 2147483647, %v413_v36 }
  0xa0   : > { %v459_v42 = vpop.permute.xlu0 %458  ;;  %v446_v51 = vand.u32 2147483647, %v442_v41 }
  0xa1   : > { %v472_v44 = vmul.f32 %v459_v42, %v448_v40  ;;  %v449_v54 = vadd.f32 %v445_v48, %v417_v43 }
  0xa2   : > { %v454_v47 = vpop.permute.xlu1 %453  ;;  %v450_v59 = vadd.f32 %v446_v51, %v418_v55 }
  0xa3   : > { %v476_v49 = vsub.f32 1.0, %v472_v44  ;;  %v471_v50 = vmul.f32 %v454_v47, %v447_v45 }
  0xa5   : > { %v480_v52 = vmax.f32 %v476_v49, 0.0  ;;  %v475_v53 = vsub.f32 1.0, %v471_v50 }
  0xa6   : > { %v464_v56 = vpop.permute.xlu1 %463 }
  0xa7   : > { %v479_v57 = vmax.f32 %v475_v53, 0.0  ;;  %v473_v58 = vmul.f32 %v464_v56, %v449_v54  ;;  %vm484_vm2 = vcmp.gt.f32.partialorder %v480_v52, 0.0 }
  0xa9   : > { %vm483_vm3 = vcmp.gt.f32.partialorder %v479_v57, 0.0  ;;  %v477_v60 = vsub.f32 1.0, %v473_v58  ;;  %v1046_v61 = vpack.c.bf16 %v480_v52, %v479_v57 }
  0xaa   : > { %vm1055_vm4 = vmpackc.low %vm484_vm2, %vm483_vm3  ;;  %v469_v62 = vpop.permute.xlu1 %468 }
  0xab   : > { %v474_v63 = vmul.f32 %v469_v62, %v450_v59  ;;  %1047 = vmatprep.subr.bf16.mxu1 %v1046_v61  ;;  %1056 = vmatpush3.bf16.msk.msra.mxu0 %vm1055_vm4, %v1217_v0  ;;  %v481_v1 = vmax.f32 %v477_v60, 0.0 }
  0xac   : > { %1049 = vmatpush3.bf16.msra.mxu1 %v1046_v61  ;;  %1057 = vmatprep.subr.bf16.mxu0 %v1214_v12  ;;  %v742_v12 = vld [vmem:[%s1438_s6] sm:$0xff] }
  0xad   : > { %v478_v2 = vsub.f32 1.0, %v474_v63  ;;  %vm485_vm5 = vcmp.gt.f32.partialorder %v481_v1, 0.0 }
  0xaf   : > { %v482_v3 = vmax.f32 %v478_v2, 0.0 }
  0xb1   : > { %vm486_vm6 = vcmp.gt.f32.partialorder %v482_v3, 0.0  ;;  %v1050_v4 = vpack.c.bf16 %v482_v3, %v481_v1 }
  0xb2   : > { %vm1058_vm7 = vmpackc.low %vm486_vm6, %vm485_vm5 }
  0xb3   : > { %1051 = vmatprep.subr.bf16.mxu1 %v1050_v4  ;;  %1059 = vmatpush3.bf16.msk.msra.mxu0 %vm1058_vm7, %v1217_v0 }
  0xb4   : > { %1053 = vmatpush3.bf16.msra.mxu1 %v1050_v4 }
  0xb6   : > { %1039 = vmatmul.mubr.msk.f32.vlgmr.msra.gmra.mrb[2].mxu0 %vm582_vm8, %v664_v5 }
  0xe6   : > { %v1018_v8 = vpop.f32.mrb[0].mxu0 }
  0xe7   : > { %v581_v9 = vmul.f32 %v1018_v8, %v579_v6  ;;  %v569_v10 = vpop.f32.mrb[1].mxu0 }
  0xe8   : > { %v580_v11 = vmul.f32 %v578_v7, %v569_v10 }
  0xea   : > { %1027 = vmatprep.mubr.msk.f32.mxu1 %vm582_vm8, %v580_v11 }
  0xeb   : > { %1028 = vmatmul.mubr.msk.f32.vlgmr.msra.gmra.mrb[0].mxu1 %vm582_vm8, %v581_v9 }
  0xec   : > { %1043 = vmatprep.mubr.msk.f32.mxu1 %vm744_vm9, %v742_v12 }
 0x189   : > { %v734_v13 = vpop.f32.mrb[2].mxu0 }
 0x18a   : > { %v735_v14 = vadd.f32 1e-06, %v734_v13  ;;  %v1040_v15 = vpop.f32.mrb[3].mxu0 }
 0x18c   : > { %1130 = vrcp.f32 %v735_v14 }
 0x196   : > { %v1131_v16 = vpop.eup %1130 }
 0x197   : > { %v739_v17 = vmul.f32 %v1131_v16, %v735_v14 }
 0x199   : > { %v740_v18 = vsub.f32 2.0, %v739_v17 }
 0x19b   : > { %v741_v19 = vmul.f32 %v1131_v16, %v740_v18 }
 0x19d   : > { %1041 = vmatprep.subr.msk.mxu1 %vm751_vm10, %v741_v19 }
 0x19e   : > { %1042 = vmatpush3.msk.msra.mxu1 %vm751_vm10, %v741_v19 }
 0x19f   : > { %1044 = vmatmul.mubr.msk.f32.vlgmr.msra.gmra.mrb[2].mxu1 %vm744_vm9, %v743_v20 }
 0x1be   : > { %v1029_v21 = vpop.f32.mrb[0].mxu1 }
 0x1bf   : > { %v655_v22 = vpop.f32.mrb[1].mxu1 }
 0x272   : > { %v1045_v23 = vpop.f32.mrb[2].mxu1 }
 0x273   : > { %v831_v24 = vmul.f32 %v1045_v23, %v1029_v21  ;;  %v821_v25 = vpop.f32.mrb[3].mxu1 }
 0x274   : > { %v830_v26 = vmul.f32 %v821_v25, %v655_v22 }
 0x275   : > { %833 = vst [vmem:[%s355_s22 + $0x8] sm:$0xff] %v831_v24 }
 0x276   : > { %832 = vst [vmem:[%s355_s22] sm:$0xff] %v830_v26 }
 0x277   : > { %1145 = shalt.err (!%p1142_p5)
}
 0x278   : > { %s1146_s20 = scalar_lea.hbm %s1384_s11, 256  ;;  %s1150_s24 = scalar_lea.hbm %s1440_s8, 512 }
 0x279   : > { %p1147_p6 = scmp.ne.s32.totalorder %s1384_s11, %s1146_s20  ;;  %p1151_p10 = scmp.lt.u32.totalorder %s1384_s11, %s1440_s8 }
 0x27a   : > { %p1152_p11 = scmp.lt.u32.totalorder %s1150_s24, %s1146_s20  ;;  %p1154_p13 = scmp.lt.u32.totalorder %s1146_s20, %s1384_s11 }
 0x27b   : > { %p1148_p7 = pnand %p1147_p6, %p1307_p4 }
 0x27c   : > { %p1153_p12 = por %p1152_p11, %p1151_p10 }
 0x27d   : > { %p1149_p9 = pneg %p1148_p7 }
 0x27e   : > { %p1155_p0 = por %p1154_p13, %p1153_p12 }
 0x280   : > { %p1156_p1 = pnand %p1155_p0, %p1149_p9 }
 0x282   : > { %1159 = shalt.err (!%p1156_p1)
}
 0x283   : > { %s1219_s14 = smov 128   ;;  %s1220_s30 = smov 256  }
 0x284   : > { %s1221_s16 = smov 8  }
 0x285   : > { %1060 = dma.vmem_to_hbm [thread:$0]  (%p1307_p4), %s1379_s23, 256, %s1384_s11, %s1386_s12, %s1219_s14, %s1220_s30, %s1221_s16  }
 0x286 PF: > { %p1066_p2 = scmp.ge.s32.totalorder %s1210_s10, 2  ;;  %s865_s19 = sand.u32 1, %s1190_s27  }
 0x287   : > { %s866_s20 = scalar_lea.sflag [#allocation3], %s865_s19 }
 0x288   : > { %p1063_p3 = pnand %p1066_p2, %p1314_p8 }
 0x28a   : > { %1185 = dma.done.wait (!%p1063_p3), %s866_s20, 256  }
 0x28b   : > { %1187 = vsyncadd (!%p1063_p3), %s866_s20, 4294967040  ;;  %s21_s10 = sadd.s32 1, %s1210_s10   ;;  %s1443_s27 = smov %s1194_s28 }
 0x28c   : > { %p18_p5 = scmp.ge.s32.totalorder %s21_s10, 4   ;;  %s1444_s28 = smov %s1198_s29 }
 0x28d   : > { %s1445_s29 = smov %s1320_s18  ;;  %s1446_s30 = smov %s1206_s9 }
 0x28e   : > { %s1447_s9 = smov %s1449_s13  ;;  %20 = sbr.rel (!%p18_p5) target bundleno = 4 (0x4), region = 96 }
 0x295   :  { %871 = vsyncpa [#allocation3], 1 }
 0x296   :  { %873 = vsyncpa [#allocation3 + $0x1], 1 }

</bundles_post_ra>
